<compile_context>
chip_gen: v7x
topology: tpu7x:2x2x1
jax: 0.10.0
libtpu: 0.0.40
codegen_flags: <defaults>
</compile_context>

<pallas_src>
import functools
import math

import jax
import jax.numpy as jnp
from jax.experimental import pallas as pl
from jax.experimental.pallas import tpu as pltpu

MEANDT = 1.0   # module default meandt=1
LANE = 128
SUBLANE = 8


def _round_up(n, m):
    return ((n + m - 1) // m) * m


# -----------------------------------------------------------------------------
# Kernel: one pallas_call covers a full T-step Euler rollout.
#   grid = (batch_tiles, T). Weights are resident (constant index_map), the
#   recurrent state lives in a VMEM scratch carried across the (sequential)
#   time axis, x[t] streams in, y[t] streams out, the final state is written
#   once at t == T-1 (accumulator-style output).
# -----------------------------------------------------------------------------
def hogru_rollout_kernel(dts_ref,                       # SMEM (T,): dt / meandt
                         x_ref, h0_ref,                 # (TB,Kin) (TB,K)
                         we_ref, be_ref,                # expand_input Linear
                         wx_ref,                        # Lx fused cols [z|r|lin]
                         wg_ref, bg_ref,                # Lh_gate fused cols [z|r]
                         wl_ref, bl_ref,                # Lh_lin
                         wy_ref,                        # Ly (no bias)
                         y_ref, hlast_ref,              # outputs
                         h_scr,                         # VMEM scratch: state
                         *, k_state_p):
    K = k_state_p
    t = pl.program_id(1)
    scale = dts_ref[t]                                  # dt/meandt (pre-scaled)

    @pl.when(t == 0)
    def _():                                            # new batch tile: load h0
        h_scr[...] = h0_ref[...]

    h = h_scr[...]
    bf16 = jnp.bfloat16

    # expand_input: xe = tanh(x @ We + be)
    xe = jnp.tanh(
        jnp.dot(x_ref[...].astype(bf16), we_ref[...],
                preferred_element_type=jnp.float32) + be_ref[...])

    # fused gate / candidate pre-activations (lane-aligned K-blocks)
    gx = jnp.dot(xe.astype(bf16), wx_ref[...],
                 preferred_element_type=jnp.float32)            # (TB, 3K)
    gh = jnp.dot(h.astype(bf16), wg_ref[...],
                 preferred_element_type=jnp.float32)            # (TB, 2K)

    gates = jax.nn.sigmoid(gx[:, :2 * K] + gh + bg_ref[...])    # one EUP pass
    z = gates[:, :K]
    r = gates[:, K:]

    lin = jnp.tanh(
        gx[:, 2 * K:]
        + jnp.dot((r * h).astype(bf16), wl_ref[...],
                  preferred_element_type=jnp.float32)
        + bl_ref[...])

    # Euler step: h_new = h + (dt/meandt) * z * (lin - h)
    h_new = h + scale * (z * (lin - h))
    h_scr[...] = h_new

    # y = Ly(h_new)
    y_ref[...] = jnp.dot(h_new.astype(bf16), wy_ref[...],
                         preferred_element_type=jnp.float32)

    @pl.when(t == pl.num_programs(1) - 1)
    def _():
        hlast_ref[...] = h_new


# -----------------------------------------------------------------------------
# Wrappers
# -----------------------------------------------------------------------------
def hogru_rollout(xs, state0, dts, packed, dims, *, meandt=MEANDT,
                  batch_tile=256):
    """Sequentially applies the HOGRUCell Euler step over the leading time axis
    of `xs` inside ONE pallas_call. Returns (ys, state_T)."""
    T, B, k_in = xs.shape
    k_state = state0.shape[1]
    k_out = dims["k_out"]
    assert k_in == dims["k_in"] and k_state == dims["k_state"]
    kin_p, ks_p, ko_p = dims["kin_p"], dims["ks_p"], dims["ko_p"]

    TB = min(_round_up(B, SUBLANE), _round_up(batch_tile, SUBLANE))
    B_p = _round_up(B, TB)

    xs_p = jnp.pad(xs.astype(jnp.float32),
                   ((0, 0), (0, B_p - B), (0, kin_p - k_in)))
    h0_p = jnp.pad(state0.astype(jnp.float32),
                   ((0, B_p - B), (0, ks_p - k_state)))
    dts_scaled = jnp.asarray(dts, jnp.float32).reshape(T) / meandt

    wmap = lambda b, t: (0, 0)      # weights: constant block -> DMA'd once / resident
    grid = (B_p // TB, T)

    kernel = functools.partial(hogru_rollout_kernel, k_state_p=ks_p)

    ys_p, hT_p = pl.pallas_call(
        kernel,
        grid=grid,
        in_specs=[
            pl.BlockSpec(memory_space=pltpu.MemorySpace.SMEM),            # dts
            pl.BlockSpec((None, TB, kin_p), lambda b, t: (t, b, 0)),      # xs (stream)
            pl.BlockSpec((TB, ks_p), lambda b, t: (b, 0)),                # h0
            pl.BlockSpec((kin_p, ks_p), wmap),                            # We
            pl.BlockSpec((1, ks_p), wmap),                                # be
            pl.BlockSpec((ks_p, 3 * ks_p), wmap),                         # Wx fused
            pl.BlockSpec((ks_p, 2 * ks_p), wmap),                         # Wg fused
            pl.BlockSpec((1, 2 * ks_p), wmap),                            # bg fused
            pl.BlockSpec((ks_p, ks_p), wmap),                             # Wl
            pl.BlockSpec((1, ks_p), wmap),                                # bl
            pl.BlockSpec((ks_p, ko_p), wmap),                             # Wy
        ],
        out_specs=(
            pl.BlockSpec((None, TB, ko_p), lambda b, t: (t, b, 0)),       # ys (stream)
            pl.BlockSpec((TB, ks_p), lambda b, t: (b, 0)),                # state_T
        ),
        out_shape=(
            jax.ShapeDtypeStruct((T, B_p, ko_p), jnp.float32),
            jax.ShapeDtypeStruct((B_p, ks_p), jnp.float32),
        ),
        scratch_shapes=[pltpu.VMEM((TB, ks_p), jnp.float32)],
        compiler_params=pltpu.CompilerParams(
            dimension_semantics=("parallel", "arbitrary"),
            vmem_limit_bytes=64 * 1024 * 1024,
        ),
    )(dts_scaled, xs_p, h0_p,
      packed["we"], packed["be"], packed["wx"], packed["wg"], packed["bg"],
      packed["wl"], packed["bl"], packed["wy"])

    return ys_p[:, :B, :k_out], hT_p[:B, :k_state]


def hogru_forward(x, state, dt, packed, dims, *, meandt=MEANDT):
    """Single HOGRUCell.forward step (train mode / Euler): (y_new, state_new)."""
    ys, h_new = hogru_rollout(x[None], state, jnp.full((1,), dt, jnp.float32),
                              packed, dims, meandt=meandt)
    return ys[0], h_new


# -----------------------------------------------------------------------------
# Parameters
# -----------------------------------------------------------------------------
def init_params(key, k_in, k_state, k_out):
    """Matches HOGRUCell.init_params: U(-stdv, stdv), Lh_gate.bias[k_state:] = -1.
    Weights are stored pre-transposed to (in, out) layout; Lx columns are
    [z | r | lin] and Lh_gate columns are [z | r] (same split as torch.split)."""
    stdv = 1.0 / math.sqrt(k_state)
    ks = jax.random.split(key, 8)
    u = lambda k, shape: jax.random.uniform(k, shape, jnp.float32, -stdv, stdv)

    W_e = u(ks[0], (k_state, k_in))            # expand_input Linear (out, in)
    b_e = u(ks[1], (k_state,))
    W_x = u(ks[2], (3 * k_state, k_state))     # Lx (no bias), rows [z | r | lin]
    W_g = u(ks[3], (2 * k_state, k_state))     # Lh_gate, rows [z | r]
    b_g = u(ks[4], (2 * k_state,))
    b_g = b_g.at[k_state:].set(-1.0)           # constant_(Lh_gate.bias[k_state:], -1)
    W_l = u(ks[5], (k_state, k_state))         # Lh_lin
    b_l = u(ks[6], (k_state,))
    W_y = u(ks[7], (k_out, k_state))           # Ly (no bias)

    return dict(we=W_e.T, be=b_e, wx=W_x.T, wg=W_g.T, bg=b_g,
                wl=W_l.T, bl=b_l, wy=W_y.T)


def pack_params(raw, k_in, k_state, k_out):
    """Pad feature dims to multiples of 128 (keeping the fused [z|r|lin]/[z|r]
    column blocks lane-aligned) and cast weight matrices to bf16. Biases stay
    f32 and are added after the f32-accumulated matmuls."""
    kin_p = _round_up(k_in, LANE)
    ks_p = _round_up(k_state, LANE)
    ko_p = _round_up(k_out, LANE)

    def pad2(w, rows, cols):
        return jnp.pad(w, ((0, rows - w.shape[0]), (0, cols - w.shape[1])))

    def pad_col_blocks(w, nblk):
        blocks = [pad2(w[:, i * k_state:(i + 1) * k_state], ks_p, ks_p)
                  for i in range(nblk)]
        return jnp.concatenate(blocks, axis=1)

    def pad_bias_blocks(b, nblk):
        blocks = [jnp.pad(b[i * k_state:(i + 1) * k_state], (0, ks_p - k_state))
                  for i in range(nblk)]
        return jnp.concatenate(blocks)[None, :]

    bf = jnp.bfloat16
    packed = dict(
        we=pad2(raw["we"], kin_p, ks_p).astype(bf),
        be=pad_bias_blocks(raw["be"], 1),
        wx=pad_col_blocks(raw["wx"], 3).astype(bf),
        wg=pad_col_blocks(raw["wg"], 2).astype(bf),
        bg=pad_bias_blocks(raw["bg"], 2),
        wl=pad2(raw["wl"], ks_p, ks_p).astype(bf),
        bl=pad_bias_blocks(raw["bl"], 1),
        wy=pad2(raw["wy"], ks_p, ko_p).astype(bf),
    )
    dims = dict(k_in=k_in, k_state=k_state, k_out=k_out,
                kin_p=kin_p, ks_p=ks_p, ko_p=ko_p)
    return packed, dims


# -----------------------------------------------------------------------------
# Pure-JAX reference (PyTorch semantics, Euler, dropout=0)
# -----------------------------------------------------------------------------
def reference_params(raw):
    """Weights rounded through bf16 exactly like the kernel weights (f32 math)."""
    p = dict(raw)
    for k in ("we", "wx", "wg", "wl", "wy"):
        p[k] = raw[k].astype(jnp.bfloat16).astype(jnp.float32)
    return p


def reference_step(x, h, dt, p, meandt=MEANDT):
    k = h.shape[1]
    xe = jnp.tanh(x @ p["we"] + p["be"])
    gx = xe @ p["wx"]
    gh = h @ p["wg"]
    gates = jax.nn.sigmoid(gx[:, :2 * k] + gh + p["bg"])
    z, r = gates[:, :k], gates[:, k:]
    lin = jnp.tanh(gx[:, 2 * k:] + (r * h) @ p["wl"] + p["bl"])
    f = z * (lin - h) / meandt
    h_new = h + dt * f
    return h_new @ p["wy"], h_new


if __name__ == "__main__":
    B, K_IN, K_STATE, K_OUT, T = 8, 8, 32, 16, 6
    DT = 0.1

    key = jax.random.PRNGKey(0)
    k_param, k_x, k_h = jax.random.split(key, 3)

    raw = init_params(k_param, K_IN, K_STATE, K_OUT)
    packed, dims = pack_params(raw, K_IN, K_STATE, K_OUT)
    ref_p = reference_params(raw)

    xs = jax.random.normal(k_x, (T, B, K_IN), dtype=jnp.float32)
    h0 = jax.random.normal(k_h, (B, K_STATE), dtype=jnp.float32)

    # --- single step (HOGRUCell.forward semantics) ---
    y1, h1 = hogru_forward(xs[0], h0, DT, packed, dims)
    jax.block_until_ready((y1, h1))
    y1_ref, h1_ref = reference_step(xs[0], h0, DT, ref_p)
    assert y1.shape == (B, K_OUT) and h1.shape == (B, K_STATE)
    assert jnp.allclose(y1, y1_ref, atol=5e-2, rtol=5e-2)
    assert jnp.allclose(h1, h1_ref, atol=5e-2, rtol=5e-2)

    # --- T-step rollout fused into one pallas_call ---
    dts = jnp.full((T,), DT, jnp.float32)
    ys, hT = hogru_rollout(xs, h0, dts, packed, dims)
    jax.block_until_ready((ys, hT))

    h_ref = h0
    ys_ref = []
    for t in range(T):
        y_ref, h_ref = reference_step(xs[t], h_ref, DT, ref_p)
        ys_ref.append(y_ref)
    ys_ref = jnp.stack(ys_ref)

    assert ys.shape == (T, B, K_OUT) and hT.shape == (B, K_STATE)
    assert jnp.allclose(ys, ys_ref, atol=5e-2, rtol=5e-2)
    assert jnp.allclose(hT, h_ref, atol=5e-2, rtol=5e-2)

    print("KERNEL_OK")
</pallas_src>

<mosaic_0001>
module attributes {stable_mosaic.version = 11 : i64} {
  func.func @hogru_rollout_kernel(%arg0: i32, %arg1: i32, %arg2: memref<1xf32, #tpu.memory_space<smem>>, %arg3: memref<1x8x128xf32, #tpu.memory_space<vmem>>, %arg4: memref<8x128xf32, #tpu.memory_space<vmem>>, %arg5: memref<128x128xbf16, #tpu.memory_space<vmem>>, %arg6: memref<1x128xf32, #tpu.memory_space<vmem>>, %arg7: memref<128x384xbf16, #tpu.memory_space<vmem>>, %arg8: memref<128x256xbf16, #tpu.memory_space<vmem>>, %arg9: memref<1x256xf32, #tpu.memory_space<vmem>>, %arg10: memref<128x128xbf16, #tpu.memory_space<vmem>>, %arg11: memref<1x128xf32, #tpu.memory_space<vmem>>, %arg12: memref<128x128xbf16, #tpu.memory_space<vmem>>, %arg13: memref<1x8x128xf32, #tpu.memory_space<vmem>>, %arg14: memref<8x128xf32, #tpu.memory_space<vmem>>, %arg15: memref<8x128xf32, #tpu.memory_space<vmem>>) attributes {dimension_semantics = [#tpu.dimension_semantics<parallel>, #tpu.dimension_semantics<arbitrary>], iteration_bounds = array<i64: 1, 1>, scalar_prefetch = 0 : i64, scratch_operands = 1 : i64, tpu.core_type = #tpu.core_type<tc>, window_params = [{transform_indices = @transform_0, window_bounds = array<i64: 1>}, {transform_indices = @transform_1, window_bounds = array<i64: 1, 8, 128>}, {transform_indices = @transform_2, window_bounds = array<i64: 8, 128>}, {pipeline_mode = #tpu.pipeline_mode<synchronous>, transform_indices = @transform_3, window_bounds = array<i64: 128, 128>}, {pipeline_mode = #tpu.pipeline_mode<synchronous>, transform_indices = @transform_4, window_bounds = array<i64: 1, 128>}, {pipeline_mode = #tpu.pipeline_mode<synchronous>, transform_indices = @transform_5, window_bounds = array<i64: 128, 384>}, {pipeline_mode = #tpu.pipeline_mode<synchronous>, transform_indices = @transform_6, window_bounds = array<i64: 128, 256>}, {pipeline_mode = #tpu.pipeline_mode<synchronous>, transform_indices = @transform_7, window_bounds = array<i64: 1, 256>}, {pipeline_mode = #tpu.pipeline_mode<synchronous>, transform_indices = @transform_8, window_bounds = array<i64: 128, 128>}, {pipeline_mode = #tpu.pipeline_mode<synchronous>, transform_indices = @transform_9, window_bounds = array<i64: 1, 128>}, {pipeline_mode = #tpu.pipeline_mode<synchronous>, transform_indices = @transform_10, window_bounds = array<i64: 128, 128>}, {transform_indices = @transform_11, window_bounds = array<i64: 1, 8, 128>}, {transform_indices = @transform_12, window_bounds = array<i64: 8, 128>}]} {
    %0 = arith.index_cast %arg1 : i32 to index
    %1 = memref.load %arg2[%0] : memref<1xf32, #tpu.memory_space<smem>>
    %c0_i32 = arith.constant 0 : i32
    %2 = arith.cmpi eq, %arg1, %c0_i32 : i32
    %3 = arith.extui %2 : i1 to i32
    %c0_i32_0 = arith.constant 0 : i32
    %4 = arith.cmpi ne, %3, %c0_i32_0 : i32
    scf.if %4 {
      %c0_33 = arith.constant 0 : index
      %c0_34 = arith.constant 0 : index
      %58 = vector.load %arg4[%c0_33, %c0_34] : memref<8x128xf32, #tpu.memory_space<vmem>>, vector<8x128xf32>
      %c0_35 = arith.constant 0 : index
      %c0_36 = arith.constant 0 : index
      %59 = vector.load %arg15[%c0_35, %c0_36] : memref<8x128xf32, #tpu.memory_space<vmem>>, vector<8x128xf32>
      tpu.vector_store %arg15[%c0_35, %c0_36], %58 {strides = array<i32>} : memref<8x128xf32, #tpu.memory_space<vmem>>, vector<8x128xf32>,
    } else {
    }
    %c0 = arith.constant 0 : index
    %c0_1 = arith.constant 0 : index
    %5 = vector.load %arg15[%c0, %c0_1] : memref<8x128xf32, #tpu.memory_space<vmem>>, vector<8x128xf32>
    %c0_2 = arith.constant 0 : index
    %c0_3 = arith.constant 0 : index
    %c0_4 = arith.constant 0 : index
    %6 = vector.load %arg3[%c0_2, %c0_3, %c0_4] : memref<1x8x128xf32, #tpu.memory_space<vmem>>, vector<1x8x128xf32>
    %7 = vector.shape_cast %6 : vector<1x8x128xf32> to vector<8x128xf32>
    %8 = arith.truncf %7 : vector<8x128xf32> to vector<8x128xbf16>
    %c0_5 = arith.constant 0 : index
    %c0_6 = arith.constant 0 : index
    %9 = vector.load %arg5[%c0_5, %c0_6] : memref<128x128xbf16, #tpu.memory_space<vmem>>, vector<128x128xbf16>
    %cst = arith.constant dense<0.000000e+00> : vector<8x128xf32>
    %10 = tpu.matmul %8, %9, %cst {dimension_numbers = #tpu.dot_dimension_numbers<[1], [0], [0], [1], [0, 0, 1, 1], [], []>} : vector<8x128xbf16>, vector<128x128xbf16>, vector<8x128xf32> -> vector<8x128xf32>
    %c0_7 = arith.constant 0 : index
    %c0_8 = arith.constant 0 : index
    %11 = vector.load %arg6[%c0_7, %c0_8] : memref<1x128xf32, #tpu.memory_space<vmem>>, vector<1x128xf32>
    %12 = vector.broadcast %11 : vector<1x128xf32> to vector<8x128xf32>
    %13 = arith.addf %10, %12 : vector<8x128xf32>
    %14 = math.tanh %13 : vector<8x128xf32>
    %15 = arith.truncf %14 : vector<8x128xf32> to vector<8x128xbf16>
    %c0_9 = arith.constant 0 : index
    %c0_10 = arith.constant 0 : index
    %16 = vector.load %arg7[%c0_9, %c0_10] : memref<128x384xbf16, #tpu.memory_space<vmem>>, vector<128x384xbf16>
    %cst_11 = arith.constant dense<0.000000e+00> : vector<8x384xf32>
    %17 = tpu.matmul %15, %16, %cst_11 {dimension_numbers = #tpu.dot_dimension_numbers<[1], [0], [0], [1], [0, 0, 1, 1], [], []>} : vector<8x128xbf16>, vector<128x384xbf16>, vector<8x384xf32> -> vector<8x384xf32>
    %18 = arith.truncf %5 : vector<8x128xf32> to vector<8x128xbf16>
    %c0_12 = arith.constant 0 : index
    %c0_13 = arith.constant 0 : index
    %19 = vector.load %arg8[%c0_12, %c0_13] : memref<128x256xbf16, #tpu.memory_space<vmem>>, vector<128x256xbf16>
    %cst_14 = arith.constant dense<0.000000e+00> : vector<8x256xf32>
    %20 = tpu.matmul %18, %19, %cst_14 {dimension_numbers = #tpu.dot_dimension_numbers<[1], [0], [0], [1], [0, 0, 1, 1], [], []>} : vector<8x128xbf16>, vector<128x256xbf16>, vector<8x256xf32> -> vector<8x256xf32>
    %21 = vector.extract_strided_slice %17 {offsets = [0, 0], sizes = [8, 256], strides = [1, 1]} : vector<8x384xf32> to vector<8x256xf32>
    %22 = arith.addf %21, %20 : vector<8x256xf32>
    %c0_15 = arith.constant 0 : index
    %c0_16 = arith.constant 0 : index
    %23 = vector.load %arg9[%c0_15, %c0_16] : memref<1x256xf32, #tpu.memory_space<vmem>>, vector<1x256xf32>
    %24 = vector.broadcast %23 : vector<1x256xf32> to vector<8x256xf32>
    %25 = arith.addf %22, %24 : vector<8x256xf32>
    %26 = arith.negf %25 : vector<8x256xf32>
    %27 = math.exp %26 : vector<8x256xf32>
    %cst_17 = arith.constant 1.000000e+00 : f32
    %28 = vector.broadcast %cst_17 : f32 to vector<8x256xf32>
    %29 = arith.addf %28, %27 : vector<8x256xf32>
    %30 = arith.divf %28, %29 : vector<8x256xf32>
    %31 = vector.extract_strided_slice %30 {offsets = [0, 0], sizes = [8, 128], strides = [1, 1]} : vector<8x256xf32> to vector<8x128xf32>
    %32 = vector.extract_strided_slice %30 {offsets = [0, 128], sizes = [8, 128], strides = [1, 1]} : vector<8x256xf32> to vector<8x128xf32>
    %33 = vector.extract_strided_slice %17 {offsets = [0, 256], sizes = [8, 128], strides = [1, 1]} : vector<8x384xf32> to vector<8x128xf32>
    %34 = arith.mulf %32, %5 : vector<8x128xf32>
    %35 = arith.truncf %34 : vector<8x128xf32> to vector<8x128xbf16>
    %c0_18 = arith.constant 0 : index
    %c0_19 = arith.constant 0 : index
    %36 = vector.load %arg10[%c0_18, %c0_19] : memref<128x128xbf16, #tpu.memory_space<vmem>>, vector<128x128xbf16>
    %cst_20 = arith.constant dense<0.000000e+00> : vector<8x128xf32>
    %37 = tpu.matmul %35, %36, %cst_20 {dimension_numbers = #tpu.dot_dimension_numbers<[1], [0], [0], [1], [0, 0, 1, 1], [], []>} : vector<8x128xbf16>, vector<128x128xbf16>, vector<8x128xf32> -> vector<8x128xf32>
    %38 = arith.addf %33, %37 : vector<8x128xf32>
    %c0_21 = arith.constant 0 : index
    %c0_22 = arith.constant 0 : index
    %39 = vector.load %arg11[%c0_21, %c0_22] : memref<1x128xf32, #tpu.memory_space<vmem>>, vector<1x128xf32>
    %40 = vector.broadcast %39 : vector<1x128xf32> to vector<8x128xf32>
    %41 = arith.addf %38, %40 : vector<8x128xf32>
    %42 = math.tanh %41 : vector<8x128xf32>
    %43 = arith.subf %42, %5 : vector<8x128xf32>
    %44 = arith.mulf %31, %43 : vector<8x128xf32>
    %45 = vector.broadcast %1 : f32 to vector<8x128xf32>
    %46 = arith.mulf %45, %44 : vector<8x128xf32>
    %47 = arith.addf %5, %46 : vector<8x128xf32>
    %c0_23 = arith.constant 0 : index
    %c0_24 = arith.constant 0 : index
    %48 = vector.load %arg15[%c0_23, %c0_24] : memref<8x128xf32, #tpu.memory_space<vmem>>, vector<8x128xf32>
    tpu.vector_store %arg15[%c0_23, %c0_24], %47 {strides = array<i32>} : memref<8x128xf32, #tpu.memory_space<vmem>>, vector<8x128xf32>,
    %49 = arith.truncf %47 : vector<8x128xf32> to vector<8x128xbf16>
    %c0_25 = arith.constant 0 : index
    %c0_26 = arith.constant 0 : index
    %50 = vector.load %arg12[%c0_25, %c0_26] : memref<128x128xbf16, #tpu.memory_space<vmem>>, vector<128x128xbf16>
    %cst_27 = arith.constant dense<0.000000e+00> : vector<8x128xf32>
    %51 = tpu.matmul %49, %50, %cst_27 {dimension_numbers = #tpu.dot_dimension_numbers<[1], [0], [0], [1], [0, 0, 1, 1], [], []>} : vector<8x128xbf16>, vector<128x128xbf16>, vector<8x128xf32> -> vector<8x128xf32>
    %c0_28 = arith.constant 0 : index
    %c0_29 = arith.constant 0 : index
    %c0_30 = arith.constant 0 : index
    %52 = vector.load %arg13[%c0_28, %c0_29, %c0_30] : memref<1x8x128xf32, #tpu.memory_space<vmem>>, vector<1x8x128xf32>
    %53 = vector.shape_cast %52 : vector<1x8x128xf32> to vector<8x128xf32>
    %54 = vector.shape_cast %51 : vector<8x128xf32> to vector<1x8x128xf32>
    tpu.vector_store %arg13[%c0_28, %c0_29, %c0_30], %54 {strides = array<i32>} : memref<1x8x128xf32, #tpu.memory_space<vmem>>, vector<1x8x128xf32>,
    %c0_i32_31 = arith.constant 0 : i32
    %55 = arith.cmpi eq, %arg1, %c0_i32_31 : i32
    %56 = arith.extui %55 : i1 to i32
    %c0_i32_32 = arith.constant 0 : i32
    %57 = arith.cmpi ne, %56, %c0_i32_32 : i32
    scf.if %57 {
      %c0_33 = arith.constant 0 : index
      %c0_34 = arith.constant 0 : index
      %58 = vector.load %arg14[%c0_33, %c0_34] : memref<8x128xf32, #tpu.memory_space<vmem>>, vector<8x128xf32>
      tpu.vector_store %arg14[%c0_33, %c0_34], %47 {strides = array<i32>} : memref<8x128xf32, #tpu.memory_space<vmem>>, vector<8x128xf32>,
    } else {
    }
    return
  }
  func.func @transform_0(%arg0: i32, %arg1: i32) -> i32 {
    %c0_i32 = arith.constant 0 : i32
    %c0_i32_0 = arith.constant 0 : i32
    return %c0_i32 : i32
  }
  func.func @transform_1(%arg0: i32, %arg1: i32) -> (i32, i32, i32) {
    %c0_i32 = arith.constant 0 : i32
    %c0_i32_0 = arith.constant 0 : i32
    return %arg1, %arg0, %c0_i32 : i32, i32, i32
  }
  func.func @transform_2(%arg0: i32, %arg1: i32) -> (i32, i32) {
    %c0_i32 = arith.constant 0 : i32
    %c0_i32_0 = arith.constant 0 : i32
    return %arg0, %c0_i32 : i32, i32
  }
  func.func @transform_3(%arg0: i32, %arg1: i32) -> (i32, i32) {
    %c0_i32 = arith.constant 0 : i32
    %c0_i32_0 = arith.constant 0 : i32
    %c0_i32_1 = arith.constant 0 : i32
    return %c0_i32, %c0_i32_0 : i32, i32
  }
  func.func @transform_4(%arg0: i32, %arg1: i32) -> (i32, i32) {
    %c0_i32 = arith.constant 0 : i32
    %c0_i32_0 = arith.constant 0 : i32
    %c0_i32_1 = arith.constant 0 : i32
    return %c0_i32, %c0_i32_0 : i32, i32
  }
  func.func @transform_5(%arg0: i32, %arg1: i32) -> (i32, i32) {
    %c0_i32 = arith.constant 0 : i32
    %c0_i32_0 = arith.constant 0 : i32
    %c0_i32_1 = arith.constant 0 : i32
    return %c0_i32, %c0_i32_0 : i32, i32
  }
  func.func @transform_6(%arg0: i32, %arg1: i32) -> (i32, i32) {
    %c0_i32 = arith.constant 0 : i32
    %c0_i32_0 = arith.constant 0 : i32
    %c0_i32_1 = arith.constant 0 : i32
    return %c0_i32, %c0_i32_0 : i32, i32
  }
  func.func @transform_7(%arg0: i32, %arg1: i32) -> (i32, i32) {
    %c0_i32 = arith.constant 0 : i32
    %c0_i32_0 = arith.constant 0 : i32
    %c0_i32_1 = arith.constant 0 : i32
    return %c0_i32, %c0_i32_0 : i32, i32
  }
  func.func @transform_8(%arg0: i32, %arg1: i32) -> (i32, i32) {
    %c0_i32 = arith.constant 0 : i32
    %c0_i32_0 = arith.constant 0 : i32
    %c0_i32_1 = arith.constant 0 : i32
    return %c0_i32, %c0_i32_0 : i32, i32
  }
  func.func @transform_9(%arg0: i32, %arg1: i32) -> (i32, i32) {
    %c0_i32 = arith.constant 0 : i32
    %c0_i32_0 = arith.constant 0 : i32
    %c0_i32_1 = arith.constant 0 : i32
    return %c0_i32, %c0_i32_0 : i32, i32
  }
  func.func @transform_10(%arg0: i32, %arg1: i32) -> (i32, i32) {
    %c0_i32 = arith.constant 0 : i32
    %c0_i32_0 = arith.constant 0 : i32
    %c0_i32_1 = arith.constant 0 : i32
    return %c0_i32, %c0_i32_0 : i32, i32
  }
  func.func @transform_11(%arg0: i32, %arg1: i32) -> (i32, i32, i32) {
    %c0_i32 = arith.constant 0 : i32
    %c0_i32_0 = arith.constant 0 : i32
    return %arg1, %arg0, %c0_i32 : i32, i32, i32
  }
  func.func @transform_12(%arg0: i32, %arg1: i32) -> (i32, i32) {
    %c0_i32 = arith.constant 0 : i32
    %c0_i32_0 = arith.constant 0 : i32
    return %arg0, %c0_i32 : i32, i32
  }
}

</mosaic_0001>

<bundles_post_ra>
// kernel: tpu_custom_call.1
= control target key start
LH: loop header
LB: loop body
LE: loop exit
PB: predicated region body
PF: predicated region fallthrough
CT: control target
= control target key end

     0   :  { %19 = vsyncpa [#allocation5], 0  ;;  %s1832_s0 = inlined_call_operand.<no memory space> [shape: f32[1], index: 0, kind: input, shape index: {}]   ;;  %s1833_s1 = inlined_call_operand.hbm [shape: f32[1,8,128], index: 1, kind: input, shape index: {}]   ;;  %s1834_s2 = inlined_call_operand.hbm [shape: f32[8,128], index: 2, kind: input, shape index: {}]   ;;  %s1835_s3 = inlined_call_operand.hbm [shape: bf16[128,128], index: 3, kind: input, shape index: {}]   ;;  %s1836_s4 = inlined_call_operand.hbm [shape: f32[1,128], index: 4, kind: input, shape index: {}]   ;;  %s1837_s5 = inlined_call_operand.hbm [shape: bf16[128,384], index: 5, kind: input, shape index: {}]   ;;  %s1838_s6 = inlined_call_operand.hbm [shape: bf16[128,256], index: 6, kind: input, shape index: {}]   ;;  %s1839_s7 = inlined_call_operand.hbm [shape: f32[1,256], index: 7, kind: input, shape index: {}]   ;;  %s1840_s8 = inlined_call_operand.hbm [shape: bf16[128,128], index: 8, kind: input, shape index: {}]   ;;  %s1841_s9 = inlined_call_operand.hbm [shape: f32[1,128], index: 9, kind: input, shape index: {}]   ;;  %s1842_s10 = inlined_call_operand.hbm [shape: bf16[128,128], index: 10, kind: input, shape index: {}]   ;;  %s1843_s11 = inlined_call_operand.hbm [shape: f32[1,8,128], index: 11, kind: output, shape index: {0}]   ;;  %s1844_s12 = inlined_call_operand.hbm [shape: f32[8,128], index: 12, kind: output, shape index: {1}]  }
   0x1   :  { %20 = vsyncpa [#allocation8], 0 }
   0x2   :  { %21 = vsyncpa [#allocation11], 0 }
   0x3   :  { %22 = vsyncpa [#allocation14], 0 }
   0x4   :  { %23 = vsyncpa [#allocation17], 0 }
   0x5   :  { %24 = vsyncpa [#allocation20], 0 }
   0x6   :  { %25 = vsyncpa [#allocation6], 0 }
   0x7   :  { %26 = vsyncpa [#allocation23], 0  ;;  %s1543_s21 = smov [#allocation7]   ;;  %s1544_s23 = smov [#allocation10]  }
   0x8   :  { %s45_s22 = sshll.u32 %s1543_s21, 4  ;;  %s67_s24 = sshll.u32 %s1544_s23, 4  ;;  %s46_s22 = int_to_ptr.vmem [resolvable:$true] %s45_s22  ;;  %s68_s24 = int_to_ptr.vmem [resolvable:$true] %s67_s24 }
   0x9   :  { %s1263_s27 = scalar_lea.hbm %s1834_s2, 128 }
   0xa   :  { %p1264_p0 = scmp.ne.s32.totalorder %s1834_s2, %s1263_s27  ;;  %p1267_p1 = scmp.lt.u32.totalorder %s1263_s27, %s1834_s2 }
   0xc   :  { %p1269_p2 = pnand %p1267_p1, %p1264_p0 }
   0xe   :  { %1272 = shalt.err (!%p1269_p2)
}
   0xf   :  { %s1273_s14 = scalar_lea.vmem %s46_s22, 128  ;;  %p1278_p4 = scmp.lt.s32.totalorder %s46_s22, %s46_s22 }
  0x10   :  { %p1274_p3 = scmp.ne.s32.totalorder %s46_s22, %s1273_s14  ;;  %p1279_p5 = scmp.lt.s32.totalorder %s1273_s14, %s1273_s14 }
  0x12   :  { %p1280_p6 = por %p1279_p5, %p1278_p4 }
  0x14   :  { %p1281_p7 = pnand %p1280_p6, %p1274_p3 }
  0x16   :  { %1284 = shalt.err (!%p1281_p7)
}
  0x17   :  { %48 = dma.hbm_to_vmem [thread:$0]  %s1834_s2, 128, %s46_s22, [#allocation8]  }
  0x18   :  { %s1285_s19 = scalar_lea.hbm %s1836_s4, 16 }
  0x19   :  { %p1286_p8 = scmp.ne.s32.totalorder %s1836_s4, %s1285_s19  ;;  %p1289_p9 = scmp.lt.u32.totalorder %s1285_s19, %s1836_s4 }
  0x1b   :  { %p1291_p10 = pnand %p1289_p9, %p1286_p8 }
  0x1d   :  { %1294 = shalt.err (!%p1291_p10)
}
  0x1e   :  { %s1295_s26 = scalar_lea.vmem %s68_s24, 16  ;;  %s1299_s27 = scalar_lea.vmem %s68_s24, 32 }
  0x1f   :  { %p1296_p11 = scmp.ne.s32.totalorder %s68_s24, %s1295_s26  ;;  %p1300_p12 = scmp.lt.s32.totalorder %s68_s24, %s68_s24 }
  0x20   :  { %p1301_p13 = scmp.lt.s32.totalorder %s1299_s27, %s1295_s26 }
  0x22   :  { %p1302_p0 = por %p1301_p13, %p1300_p12 }
  0x24   :  { %p1303_p1 = pnand %p1302_p0, %p1296_p11 }
  0x26   :  { %1306 = shalt.err (!%p1303_p1)
}
  0x27   :  { %70 = dma.hbm_to_vmem [thread:$0]  %s1836_s4, 16, %s68_s24, [#allocation11]  }
  0x28   :  { %s1545_s28 = smov [#allocation13]   ;;  %s1307_s14 = scalar_lea.hbm %s1838_s6, 2048 }
  0x29   :  { %s88_s29 = sshll.u32 %s1545_s28, 4  ;;  %p1308_p2 = scmp.ne.s32.totalorder %s1838_s6, %s1307_s14  ;;  %s89_s29 = int_to_ptr.vmem [resolvable:$true] %s88_s29 }
  0x2a   :  { %p1311_p3 = scmp.lt.u32.totalorder %s1307_s14, %s1838_s6 }
  0x2c   :  { %p1313_p4 = pnand %p1311_p3, %p1308_p2 }
  0x2e   :  { %1316 = shalt.err (!%p1313_p4)
}
  0x2f   :  { %s1317_s19 = scalar_lea.vmem %s89_s29, 2048  ;;  %p1322_p6 = scmp.lt.s32.totalorder %s89_s29, %s89_s29 }
  0x30   :  { %p1318_p5 = scmp.ne.s32.totalorder %s89_s29, %s1317_s19  ;;  %p1323_p7 = scmp.lt.s32.totalorder %s1317_s19, %s1317_s19 }
  0x32   :  { %p1324_p8 = por %p1323_p7, %p1322_p6 }
  0x34   :  { %p1325_p9 = pnand %p1324_p8, %p1318_p5 }
  0x36   :  { %1328 = shalt.err (!%p1325_p9)
}
  0x37   :  { %s1546_s4 = smov 128   ;;  %s1547_s24 = smov 8  }
  0x38   :  { %94 = dma.hbm_to_vmem [thread:$0]  %s1838_s6, 2048, %s89_s29, [#allocation14], %s1546_s4, %s1546_s4, %s1547_s24  }
  0x39   :  { %s1548_s23 = smov [#allocation16]   ;;  %s1549_s26 = smov [#allocation4]  }
  0x3a   :  { %s110_s25 = sshll.u32 %s1548_s23, 4  ;;  %s35_s27 = sshll.u32 %s1549_s26, 4  ;;  %s111_s25 = int_to_ptr.vmem [resolvable:$true] %s110_s25  ;;  %s36_s27 = int_to_ptr.vmem [resolvable:$true] %s35_s27 }
  0x3b   :  { %s1329_s28 = scalar_lea.hbm %s1840_s8, 1024 }
  0x3c   :  { %p1330_p10 = scmp.ne.s32.totalorder %s1840_s8, %s1329_s28  ;;  %p1333_p11 = scmp.lt.u32.totalorder %s1329_s28, %s1840_s8 }
  0x3e   :  { %p1335_p12 = pnand %p1333_p11, %p1330_p10 }
  0x40   :  { %1338 = shalt.err (!%p1335_p12)
}
  0x41   :  { %s1339_s6 = scalar_lea.vmem %s111_s25, 1024  ;;  %p1344_p0 = scmp.lt.s32.totalorder %s111_s25, %s111_s25 }
  0x42   :  { %p1340_p13 = scmp.ne.s32.totalorder %s111_s25, %s1339_s6  ;;  %p1345_p1 = scmp.lt.s32.totalorder %s1339_s6, %s1339_s6 }
  0x44   :  { %p1346_p2 = por %p1345_p1, %p1344_p0 }
  0x46   :  { %p1347_p3 = pnand %p1346_p2, %p1340_p13 }
  0x48   :  { %1350 = shalt.err (!%p1347_p3)
}
  0x49   :  { %s1550_s29 = smov 64   ;;  %s1551_s16 = smov 4  }
  0x4a   :  { %116 = dma.hbm_to_vmem [thread:$0]  %s1840_s8, 1024, %s111_s25, [#allocation17], %s1550_s29, %s1550_s29, %s1551_s16  }
  0x4b   :  { %s1351_s24 = scalar_lea.hbm %s1833_s1, 128 }
  0x4c   :  { %p1352_p4 = scmp.ne.s32.totalorder %s1833_s1, %s1351_s24  ;;  %p1355_p5 = scmp.lt.u32.totalorder %s1351_s24, %s1833_s1 }
  0x4e   :  { %p1357_p6 = pnand %p1355_p5, %p1352_p4 }
  0x50   :  { %1360 = shalt.err (!%p1357_p6)
}
  0x51   :  { %s1361_s2 = scalar_lea.vmem %s36_s27, 128  ;;  %p1366_p8 = scmp.lt.s32.totalorder %s36_s27, %s36_s27 }
  0x52   :  { %p1362_p7 = scmp.ne.s32.totalorder %s36_s27, %s1361_s2  ;;  %p1367_p9 = scmp.lt.s32.totalorder %s1361_s2, %s1361_s2 }
  0x54   :  { %p1368_p10 = por %p1367_p9, %p1366_p8 }
  0x56   :  { %p1369_p11 = pnand %p1368_p10, %p1362_p7 }
  0x58   :  { %1372 = shalt.err (!%p1369_p11)
}
  0x59   :  { %38 = dma.hbm_to_vmem [thread:$0]  %s1833_s1, 128, %s36_s27, [#allocation5]  }
  0x5a   :  { %s1552_s22 = smov [#allocation9]   ;;  %s1553_s30 = smov [#allocation12]  }
  0x5b   :  { %s54_s28 = sshll.u32 %s1552_s22, 4  ;;  %s76_s13 = sshll.u32 %s1553_s30, 4  ;;  %s55_s28 = int_to_ptr.vmem [resolvable:$true] %s54_s28  ;;  %s77_s13 = int_to_ptr.vmem [resolvable:$true] %s76_s13 }
  0x5c   :  { %s1373_s6 = scalar_lea.hbm %s1835_s3, 1024 }
  0x5d   :  { %p1374_p12 = scmp.ne.s32.totalorder %s1835_s3, %s1373_s6  ;;  %p1377_p13 = scmp.lt.u32.totalorder %s1373_s6, %s1835_s3 }
  0x5f   :  { %p1379_p0 = pnand %p1377_p13, %p1374_p12 }
  0x61   :  { %1382 = shalt.err (!%p1379_p0)
}
  0x62   :  { %s1383_s1 = scalar_lea.vmem %s55_s28, 1024  ;;  %p1388_p2 = scmp.lt.s32.totalorder %s55_s28, %s55_s28 }
  0x63   :  { %p1384_p1 = scmp.ne.s32.totalorder %s55_s28, %s1383_s1  ;;  %p1389_p3 = scmp.lt.s32.totalorder %s1383_s1, %s1383_s1 }
  0x65   :  { %p1390_p4 = por %p1389_p3, %p1388_p2 }
  0x67   :  { %p1391_p5 = pnand %p1390_p4, %p1384_p1 }
  0x69   :  { %1394 = shalt.err (!%p1391_p5)
}
  0x6a   :  { %60 = dma.hbm_to_vmem [thread:$0]  %s1835_s3, 1024, %s55_s28, [#allocation8], %s1550_s29, %s1550_s29, %s1551_s16  }
  0x6b   :  { %s1395_s23 = scalar_lea.hbm %s1837_s5, 3072 }
  0x6c   :  { %p1396_p6 = scmp.ne.s32.totalorder %s1837_s5, %s1395_s23  ;;  %p1399_p7 = scmp.lt.u32.totalorder %s1395_s23, %s1837_s5 }
  0x6e   :  { %p1401_p8 = pnand %p1399_p7, %p1396_p6 }
  0x70   :  { %1404 = shalt.err (!%p1401_p8)
}
  0x71   :  { %s1405_s22 = scalar_lea.vmem %s77_s13, 3072  ;;  %p1410_p10 = scmp.lt.s32.totalorder %s77_s13, %s77_s13 }
  0x72   :  { %p1406_p9 = scmp.ne.s32.totalorder %s77_s13, %s1405_s22  ;;  %p1411_p11 = scmp.lt.s32.totalorder %s1405_s22, %s1405_s22 }
  0x74   :  { %p1412_p12 = por %p1411_p11, %p1410_p10 }
  0x76   :  { %p1413_p13 = pnand %p1412_p12, %p1406_p9 }
  0x78   :  { %1416 = shalt.err (!%p1413_p13)
}
  0x79   :  { %s1554_s3 = smov 192   ;;  %s1555_s28 = smov 12  }
  0x7a   :  { %82 = dma.hbm_to_vmem [thread:$0]  %s1837_s5, 3072, %s77_s13, [#allocation11], %s1554_s3, %s1554_s3, %s1555_s28  }
  0x7b   :  { %s1556_s15 = smov [#allocation15]   ;;  %s1557_s17 = smov [#allocation18]  }
  0x7c   :  { %s101_s6 = sshll.u32 %s1556_s15, 4  ;;  %s123_s18 = sshll.u32 %s1557_s17, 4  ;;  %s102_s6 = int_to_ptr.vmem [resolvable:$true] %s101_s6  ;;  %s124_s18 = int_to_ptr.vmem [resolvable:$true] %s123_s18 }
  0x7d   :  { %s1417_s1 = scalar_lea.hbm %s1839_s7, 32 }
  0x7e   :  { %p1418_p0 = scmp.ne.s32.totalorder %s1839_s7, %s1417_s1  ;;  %p1421_p1 = scmp.lt.u32.totalorder %s1417_s1, %s1839_s7 }
  0x80   :  { %p1423_p2 = pnand %p1421_p1, %p1418_p0 }
  0x82   :  { %1426 = shalt.err (!%p1423_p2)
}
  0x83   :  { %s1427_s5 = scalar_lea.vmem %s102_s6, 32  ;;  %p1432_p4 = scmp.lt.s32.totalorder %s102_s6, %s102_s6 }
  0x84   :  { %p1428_p3 = scmp.ne.s32.totalorder %s102_s6, %s1427_s5  ;;  %p1433_p5 = scmp.lt.s32.totalorder %s1427_s5, %s1427_s5 }
  0x86   :  { %p1434_p6 = por %p1433_p5, %p1432_p4 }
  0x88   :  { %p1435_p7 = pnand %p1434_p6, %p1428_p3 }
  0x8a   :  { %1438 = shalt.err (!%p1435_p7)
}
  0x8b   :  { %104 = dma.hbm_to_vmem [thread:$0]  %s1839_s7, 32, %s102_s6, [#allocation14]  }
  0x8c   :  { %s1439_s8 = scalar_lea.hbm %s1841_s9, 16 }
  0x8d   :  { %p1440_p8 = scmp.ne.s32.totalorder %s1841_s9, %s1439_s8  ;;  %p1443_p9 = scmp.lt.u32.totalorder %s1439_s8, %s1841_s9 }
  0x8f   :  { %p1445_p10 = pnand %p1443_p9, %p1440_p8 }
  0x91   :  { %1448 = shalt.err (!%p1445_p10)
}
  0x92   :  { %s1449_s30 = scalar_lea.vmem %s124_s18, 16  ;;  %s1453_s14 = scalar_lea.vmem %s124_s18, 32 }
  0x93   :  { %p1450_p11 = scmp.ne.s32.totalorder %s124_s18, %s1449_s30  ;;  %p1454_p12 = scmp.lt.s32.totalorder %s124_s18, %s124_s18 }
  0x94   :  { %p1455_p13 = scmp.lt.s32.totalorder %s1453_s14, %s1449_s30 }
  0x96   :  { %p1456_p0 = por %p1455_p13, %p1454_p12 }
  0x98   :  { %p1457_p1 = pnand %p1456_p0, %p1450_p11 }
  0x9a   :  { %1460 = shalt.err (!%p1457_p1)
}
  0x9b   :  { %126 = dma.hbm_to_vmem [thread:$0]  %s1841_s9, 16, %s124_s18, [#allocation17]  }
  0x9c   :  { %s1558_s6 = smov [#allocation19]   ;;  %s1461_s1 = scalar_lea.hbm %s1842_s10, 1024 }
  0x9d   :  { %s132_s17 = sshll.u32 %s1558_s6, 4  ;;  %p1462_p2 = scmp.ne.s32.totalorder %s1842_s10, %s1461_s1  ;;  %s133_s17 = int_to_ptr.vmem [resolvable:$true] %s132_s17 }
  0x9e   :  { %p1465_p3 = scmp.lt.u32.totalorder %s1461_s1, %s1842_s10 }
  0xa0   :  { %p1467_p4 = pnand %p1465_p3, %p1462_p2 }
  0xa2   :  { %1470 = shalt.err (!%p1467_p4)
}
  0xa3   :  { %s1471_s5 = scalar_lea.vmem %s133_s17, 1024  ;;  %p1476_p6 = scmp.lt.s32.totalorder %s133_s17, %s133_s17 }
  0xa4   :  { %p1472_p5 = scmp.ne.s32.totalorder %s133_s17, %s1471_s5  ;;  %p1477_p7 = scmp.lt.s32.totalorder %s1471_s5, %s1471_s5 }
  0xa6   :  { %p1478_p8 = por %p1477_p7, %p1476_p6 }
  0xa8   :  { %p1479_p9 = pnand %p1478_p8, %p1472_p5 }
  0xaa   :  { %1482 = shalt.err (!%p1479_p9)
}
  0xab   :  { %138 = dma.hbm_to_vmem [thread:$0]  %s1842_s10, 1024, %s133_s17, [#allocation20], %s1550_s29, %s1550_s29, %s1551_s16  }
  0xac   :  { %1527 = dma.done.wait [#allocation5], 128  }
  0xad   :  { %1528 = vsyncadd [#allocation5], 4294967168 }
  0xae   :  { %1529 = dma.done.wait [#allocation8], 1152  }
  0xaf   :  { %1530 = vsyncadd [#allocation8], 4294966144 }
  0xb0   :  { %1531 = dma.done.wait [#allocation11], 3088  }
  0xb1   :  { %1532 = vsyncadd [#allocation11], 4294964208 }
  0xb2   :  { %1533 = dma.done.wait [#allocation14], 2080  }
  0xb3   :  { %1534 = vsyncadd [#allocation14], 4294965216 }
  0xb4   :  { %1535 = dma.done.wait [#allocation17], 1040  }
  0xb5   :  { %1536 = vsyncadd [#allocation17], 4294966256 }
  0xb6   :  { %1537 = dma.done.wait [#allocation20], 1024  }
  0xb7   :  { %1538 = vsyncadd [#allocation20], 4294966272  ;;  %v1559_v0 = vmov 0.0   ;;  %vm1560_vm0 = vmmov 0   ;;  %v1171_v1 = vld [vmem:[#allocation9] sm:$0xff]   ;;  %v1172_v2 = vld [vmem:[#allocation9 + $0x8] sm:$0xff]   ;;  %v676_v62 = vlaneseq }
  0xb8   :  { %1070 = vmatprep.subr.bf16.mxu0 %v1559_v0  ;;  %1086 = vmatprep.mubr.msk.bf16.mxu0 %vm1560_vm0, %v1559_v0  ;;  %v1173_v3 = vld [vmem:[#allocation9 + $0x10] sm:$0xff]   ;;  %v1174_v6 = vld [vmem:[#allocation9 + $0x18] sm:$0xff]   ;;  %v1175_v10 = vld [vmem:[#allocation9 + $0x20] sm:$0xff]   ;;  %v1561_v36 = vmov 0   ;;  %s1562_s16 = smov [#allocation22]  }
  0xb9   :  { %1071 = vmatpush3.bf16.msra.mxu0 %v1171_v1  ;;  %v1179_v4 = vld [vmem:[#allocation12 + $0x4] ss:$12 sps:$4 sm:$0xff]   ;;  %v1181_v5 = vld [vmem:[#allocation12] ss:$12 sps:$4 sm:$0xff]   ;;  %v1183_v7 = vld [vmem:[#allocation12 + $0x1c] ss:$12 sps:$4 sm:$0xff]   ;;  %485 = vmatprep.mubr.bf16.mxu1 %v1561_v36 }
  0xba   :  { %1072 = vmatprep.subr.bf16.mxu0 %v1559_v0  ;;  %453 = vmatprep.subr.bf16.mxu1 %v1179_v4  ;;  %v1185_v8 = vld [vmem:[#allocation12 + $0x18] ss:$12 sps:$4 sm:$0xff]   ;;  %v1187_v9 = vld [vmem:[#allocation12 + $0x34] ss:$12 sps:$4 sm:$0xff]   ;;  %v1189_v11 = vld [vmem:[#allocation12 + $0x30] ss:$12 sps:$4 sm:$0xff]  }
  0xbb   :  { %454 = vmatpush1.bf16.msra.mxu1 %v1181_v5  ;;  %v1191_v12 = vld [vmem:[#allocation12 + $0x4c] ss:$12 sps:$4 sm:$0xff]   ;;  %v1193_v14 = vld [vmem:[#allocation12 + $0x48] ss:$12 sps:$4 sm:$0xff]   ;;  %v1195_v15 = vld [vmem:[#allocation12 + $0x64] ss:$12 sps:$4 sm:$0xff]  }
  0xbc   :  { %455 = vmatprep.subr.bf16.mxu1 %v1183_v7  ;;  %v1176_v13 = vld [vmem:[#allocation9 + $0x28] sm:$0xff]   ;;  %v1177_v16 = vld [vmem:[#allocation9 + $0x30] sm:$0xff]   ;;  %v1178_v17 = vld [vmem:[#allocation9 + $0x38] sm:$0xff]   ;;  %v677_v63 = vshrl.u32 %v676_v62, 7  ;;  %s948_s13 = sshll.u32 %s1562_s16, 4  ;;  %s949_s13 = int_to_ptr.vmem [resolvable:$true] %s948_s13 }
  0xbd   :  { %1073 = vmatpush3.bf16.msra.mxu0 %v1172_v2  ;;  %v178_v18 = vld [vmem:[#allocation4] sm:$0xff]  ;;  %v1190_v22 = vld [vmem:[#allocation12 + $0x38] ss:$12 sps:$4 sm:$0xff]   ;;  %v1199_v26 = vld [vmem:[#allocation12 + $0x7c] ss:$12 sps:$4 sm:$0xff]   ;;  %s1483_s23 = scalar_lea.vmem %s949_s13, 128  ;;  %p1488_p11 = scmp.lt.s32.totalorder %s949_s13, %s949_s13 }
  0xbe   :  { %1074 = vmatprep.subr.bf16.mxu0 %v1559_v0  ;;  %v1182_v19 = vld [vmem:[#allocation12 + $0x8] ss:$12 sps:$4 sm:$0xff]   ;;  %v179_v20 = vpack.c.bf16 %v178_v18, %v178_v18  ;;  %v1186_v21 = vld [vmem:[#allocation12 + $0x20] ss:$12 sps:$4 sm:$0xff]   ;;  %v1194_v23 = vld [vmem:[#allocation12 + $0x50] ss:$12 sps:$4 sm:$0xff]   ;;  %p1484_p10 = scmp.ne.s32.totalorder %s949_s13, %s1483_s23  ;;  %p1489_p12 = scmp.lt.s32.totalorder %s1483_s23, %s1483_s23 }
  0xbf   :  { %456 = vmatpush1.bf16.msra.mxu1 %v1185_v8  ;;  %v1197_v24 = vld [vmem:[#allocation12 + $0x60] ss:$12 sps:$4 sm:$0xff]   ;;  %v1198_v25 = vld [vmem:[#allocation12 + $0x68] ss:$12 sps:$4 sm:$0xff]   ;;  %v1201_v27 = vld [vmem:[#allocation12 + $0x78] ss:$12 sps:$4 sm:$0xff]  }
  0xc0   :  { %457 = vmatprep.subr.bf16.mxu1 %v1187_v9  ;;  %v1202_v28 = vld [vmem:[#allocation12 + $0x80] ss:$12 sps:$4 sm:$0xff]   ;;  %v1205_v30 = vld [vmem:[#allocation12 + $0x90] ss:$12 sps:$4 sm:$0xff]   ;;  %v1206_v31 = vld [vmem:[#allocation12 + $0x98] ss:$12 sps:$4 sm:$0xff]   ;;  %p1490_p13 = por %p1489_p12, %p1488_p11 }
  0xc1   :  { %1075 = vmatpush3.bf16.msra.mxu0 %v1173_v3  ;;  %v1203_v29 = vld [vmem:[#allocation12 + $0x94] ss:$12 sps:$4 sm:$0xff]   ;;  %v1207_v32 = vld [vmem:[#allocation12 + $0xac] ss:$12 sps:$4 sm:$0xff]   ;;  %v1210_v34 = vld [vmem:[#allocation12 + $0xb0] ss:$12 sps:$4 sm:$0xff]  }
  0xc2   :  { %1076 = vmatprep.subr.bf16.mxu0 %v1559_v0  ;;  %v1209_v33 = vld [vmem:[#allocation12 + $0xa8] ss:$12 sps:$4 sm:$0xff]   ;;  %v1213_v35 = vld [vmem:[#allocation13 + $0x4] ss:$8 sps:$4 sm:$0xff]   ;;  %v966_v37 = vld [vmem:[#allocation10] ss:$0 sm:$0xff]  ;;  %p1491_p0 = pnand %p1490_p13, %p1484_p10 }
  0xc3   :  { %458 = vmatpush1.bf16.msra.mxu1 %v1189_v11  ;;  %v1211_v44 = vld [vmem:[#allocation13] ss:$8 sps:$4 sm:$0xff]   ;;  %v1216_v46 = vld [vmem:[#allocation13 + $0x14] ss:$8 sps:$4 sm:$0xff]   ;;  %v1214_v47 = vld [vmem:[#allocation13 + $0x10] ss:$8 sps:$4 sm:$0xff]  }
  0xc4   :  { %459 = vmatprep.subr.bf16.mxu1 %v1191_v12  ;;  %v1219_v48 = vld [vmem:[#allocation13 + $0x24] ss:$8 sps:$4 sm:$0xff]   ;;  %v1217_v49 = vld [vmem:[#allocation13 + $0x20] ss:$8 sps:$4 sm:$0xff]   ;;  %v1222_v50 = vld [vmem:[#allocation13 + $0x34] ss:$8 sps:$4 sm:$0xff]  }
  0xc5   :  { %1077 = vmatpush3.bf16.msra.mxu0 %v1174_v6  ;;  %v1220_v51 = vld [vmem:[#allocation13 + $0x30] ss:$8 sps:$4 sm:$0xff]   ;;  %v1225_v52 = vld [vmem:[#allocation13 + $0x44] ss:$8 sps:$4 sm:$0xff]   ;;  %v1223_v53 = vld [vmem:[#allocation13 + $0x40] ss:$8 sps:$4 sm:$0xff]  }
  0xc6   :  { %1078 = vmatprep.subr.bf16.mxu0 %v1559_v0  ;;  %v1228_v54 = vld [vmem:[#allocation13 + $0x54] ss:$8 sps:$4 sm:$0xff]   ;;  %v1226_v55 = vld [vmem:[#allocation13 + $0x50] ss:$8 sps:$4 sm:$0xff]   ;;  %v1231_v56 = vld [vmem:[#allocation13 + $0x64] ss:$8 sps:$4 sm:$0xff]  }
  0xc7   :  { %460 = vmatpush1.bf16.msra.mxu1 %v1193_v14  ;;  %v1229_v57 = vld [vmem:[#allocation13 + $0x60] ss:$8 sps:$4 sm:$0xff]   ;;  %v1234_v58 = vld [vmem:[#allocation13 + $0x74] ss:$8 sps:$4 sm:$0xff]   ;;  %v1232_v59 = vld [vmem:[#allocation13 + $0x70] ss:$8 sps:$4 sm:$0xff]  }
  0xc8   :  { %461 = vmatprep.subr.bf16.mxu1 %v1195_v15  ;;  %v1781_v60 = vld [vmem:[#allocation7] sm:$0xff]  ;;  %v678_v1 = vsub.s32 0, %v677_v63  ;;  %v674_v2 = vld [vmem:[#allocation15] sm:$0x3]  ;;  %v1235_v4 = vld [vmem:[#allocation16] sm:$0xff]  }
  0xc9   :  { %1079 = vmatpush3.bf16.msra.mxu0 %v1175_v10  ;;  %v534_v61 = vpack.c.bf16 %v1781_v60, %v1781_v60  ;;  %v1236_v5 = vld [vmem:[#allocation16 + $0x8] sm:$0xff]   ;;  %v1237_v6 = vld [vmem:[#allocation16 + $0x10] sm:$0xff]   ;;  %v1238_v7 = vld [vmem:[#allocation16 + $0x18] sm:$0xff]  }
  0xca   :  { %1080 = vmatprep.subr.bf16.mxu0 %v1559_v0  ;;  %v679_v3 = vrot.slane %v674_v2, %v678_v1  ;;  %v1239_v8 = vld [vmem:[#allocation16 + $0x20] sm:$0xff]   ;;  %v1240_v9 = vld [vmem:[#allocation16 + $0x28] sm:$0xff]   ;;  %v1241_v10 = vld [vmem:[#allocation16 + $0x30] sm:$0xff]  }
  0xcb   :  { %462 = vmatpush1.bf16.msra.mxu1 %v1197_v24  ;;  %v1242_v11 = vld [vmem:[#allocation16 + $0x38] sm:$0xff]   ;;  %v1243_v12 = vld [vmem:[#allocation19] sm:$0xff]  }
  0xcc   :  { %463 = vmatprep.subr.bf16.mxu1 %v1199_v26 }
  0xcd   :  { %1081 = vmatpush3.bf16.msra.mxu0 %v1176_v13  ;;  %v1244_v13 = vld [vmem:[#allocation19 + $0x8] sm:$0xff]  }
  0xce   :  { %1082 = vmatprep.subr.bf16.mxu0 %v1559_v0 }
  0xcf   :  { %464 = vmatpush1.bf16.msra.mxu1 %v1201_v27 }
  0xd0   :  { %465 = vmatprep.subr.bf16.mxu1 %v1203_v29 }
  0xd1   :  { %1083 = vmatpush3.bf16.msra.mxu0 %v1177_v16 }
  0xd2   :  { %1084 = vmatprep.subr.bf16.mxu0 %v1559_v0 }
  0xd3   :  { %466 = vmatpush1.bf16.msra.mxu1 %v1205_v30 }
  0xd4   :  { %467 = vmatprep.subr.bf16.mxu1 %v1207_v32 }
  0xd5   :  { %1085 = vmatpush3.bf16.msra.mxu0 %v1178_v17 }
  0xd6   :  { %1090 = vmatprep.subr.bf16.mxu0 %v1559_v0 }
  0xd7   :  { %468 = vmatpush1.bf16.msra.mxu1 %v1209_v33 }
  0xd8   :  { %1087 = vmatmul.mubr.bf16.vlgmr.msra.gmra.mrb[0].mxu0 %v179_v20  ;;  %631 = vmatprep.subr.bf16.mxu1 %v1213_v35 }
  0xd9   :  { %1091 = vmatpush3.bf16.msra.mxu0 %v1182_v19  ;;  %1106 = vmatprep.mubr.msk.bf16.mxu0 %vm1560_vm0, %v1559_v0 }
  0xda   :  { %1092 = vmatprep.subr.bf16.mxu0 %v1559_v0 }
  0xdd   :  { %1093 = vmatpush3.bf16.msra.mxu0 %v1186_v21 }
  0xde   :  { %1094 = vmatprep.subr.bf16.mxu0 %v1559_v0 }
  0xe1   :  { %1095 = vmatpush3.bf16.msra.mxu0 %v1190_v22  ;;  %v682_v22 = vsub.s32 1, %v677_v63 }
  0xe2   :  { %1096 = vmatprep.subr.bf16.mxu0 %v1559_v0 }
  0xe3   :  { %v683_v24 = vrot.slane %v674_v2, %v682_v22 }
  0xe5   :  { %1097 = vmatpush3.bf16.msra.mxu0 %v1194_v23 }
  0xe6   :  { %1098 = vmatprep.subr.bf16.mxu0 %v1559_v0 }
  0xe9   :  { %1099 = vmatpush3.bf16.msra.mxu0 %v1198_v25 }
  0xea   :  { %1100 = vmatprep.subr.bf16.mxu0 %v1559_v0 }
  0xed   :  { %1101 = vmatpush3.bf16.msra.mxu0 %v1202_v28 }
  0xee   :  { %1102 = vmatprep.subr.bf16.mxu0 %v1559_v0 }
  0xf1   :  { %1103 = vmatpush3.bf16.msra.mxu0 %v1206_v31 }
  0xf2   :  { %1104 = vmatprep.subr.bf16.mxu0 %v1559_v0 }
  0xf5   :  { %1105 = vmatpush3.bf16.msra.mxu0 %v1210_v34 }
  0xf6   :  { %1110 = vmatprep.subr.bf16.mxu0 %v1559_v0 }
 0x1ab   :  { %v285_v38 = vpop.f32.mrb[0].mxu0 }
 0x1ac   :  { %v286_v39 = vadd.f32 %v966_v37, %v285_v38  ;;  %v1088_v40 = vpop.f32.mrb[1].mxu0  ;;  %v1245_v38 = vld [vmem:[#allocation19 + $0x10] sm:$0xff]  }
 0x1ad   :  { %v288_v41 = vpop.f32.mrb[2].mxu0  ;;  %v1247_v40 = vld [vmem:[#allocation19 + $0x20] sm:$0xff]  }
 0x1ae   :  { %1251 = vtanh.f32 %v286_v39  ;;  %v1089_v42 = vpop.f32.mrb[3].mxu0  ;;  %v1246_v39 = vld [vmem:[#allocation19 + $0x18] sm:$0xff]   ;;  %v1248_v41 = vld [vmem:[#allocation19 + $0x28] sm:$0xff]  }
 0x1af   :  { %v1249_v42 = vld [vmem:[#allocation19 + $0x30] sm:$0xff]  }
 0x1b8   :  { %v1252_v43 = vpop.eup %1251 }
 0x1b9   :  { %v292_v45 = vpack.c.bf16 %v1252_v43, %v1252_v43  ;;  %v1250_v43 = vld [vmem:[#allocation19 + $0x38] sm:$0xff]  }
 0x1bb   :  { %486 = vmatmul.mubr.bf16.vlgmr.msra.gmra.mrb[0].mxu1 %v292_v45  ;;  %1107 = vmatmul.mubr.bf16.vlgmr.msra.gmra.mrb[4].mxu0 %v292_v45 }
 0x1bc   :  { %632 = vmatpush1.bf16.msra.mxu1 %v1211_v44  ;;  %663 = vmatprep.mubr.bf16.mxu1 %v1561_v36 }
 0x1bd   :  { %633 = vmatprep.subr.bf16.mxu1 %v1216_v46  ;;  %1126 = vmatprep.mubr.msk.bf16.mxu0 %vm1560_vm0, %v1559_v0 }
 0x1be   :  { %1111 = vmatpush3.bf16.msra.mxu0 %v1235_v4 }
 0x1bf   :  { %1112 = vmatprep.subr.bf16.mxu0 %v1559_v0 }
 0x1c0   :  { %634 = vmatpush1.bf16.msra.mxu1 %v1214_v47  ;;  %v1025_v47 = vld [vmem:[#allocation18] ss:$0 sm:$0xff] }
 0x1c1   :  { %635 = vmatprep.subr.bf16.mxu1 %v1219_v48 }
 0x1c2   :  { %1113 = vmatpush3.bf16.msra.mxu0 %v1236_v5 }
 0x1c3   :  { %1114 = vmatprep.subr.bf16.mxu0 %v1559_v0 }
 0x1c4   :  { %636 = vmatpush1.bf16.msra.mxu1 %v1217_v49 }
 0x1c5   :  { %637 = vmatprep.subr.bf16.mxu1 %v1222_v50 }
 0x1c6   :  { %1115 = vmatpush3.bf16.msra.mxu0 %v1237_v6 }
 0x1c7   :  { %1116 = vmatprep.subr.bf16.mxu0 %v1559_v0 }
 0x1c8   :  { %638 = vmatpush1.bf16.msra.mxu1 %v1220_v51 }
 0x1c9   :  { %639 = vmatprep.subr.bf16.mxu1 %v1225_v52 }
 0x1ca   :  { %1117 = vmatpush3.bf16.msra.mxu0 %v1238_v7 }
 0x1cb   :  { %1118 = vmatprep.subr.bf16.mxu0 %v1559_v0 }
 0x1cc   :  { %640 = vmatpush1.bf16.msra.mxu1 %v1223_v53 }
 0x1cd   :  { %641 = vmatprep.subr.bf16.mxu1 %v1228_v54 }
 0x1ce   :  { %1119 = vmatpush3.bf16.msra.mxu0 %v1239_v8 }
 0x1cf   :  { %1120 = vmatprep.subr.bf16.mxu0 %v1559_v0 }
 0x1d0   :  { %642 = vmatpush1.bf16.msra.mxu1 %v1226_v55 }
 0x1d1   :  { %643 = vmatprep.subr.bf16.mxu1 %v1231_v56 }
 0x1d2   :  { %1121 = vmatpush3.bf16.msra.mxu0 %v1240_v9 }
 0x1d3   :  { %1122 = vmatprep.subr.bf16.mxu0 %v1559_v0 }
 0x1d4   :  { %644 = vmatpush1.bf16.msra.mxu1 %v1229_v57 }
 0x1d5   :  { %645 = vmatprep.subr.bf16.mxu1 %v1234_v58 }
 0x1d6   :  { %1123 = vmatpush3.bf16.msra.mxu0 %v1241_v10 }
 0x1d7   :  { %1124 = vmatprep.subr.bf16.mxu0 %v1559_v0 }
 0x1d8   :  { %646 = vmatpush1.bf16.msra.mxu1 %v1232_v59 }
 0x1d9   :  { %1130 = vmatprep.subr.bf16.mxu1 %v1559_v0 }
 0x1da   :  { %1125 = vmatpush3.bf16.msra.mxu0 %v1242_v11 }
 0x1db   :  { %664 = vmatmul.mubr.bf16.vlgmr.msra.gmra.mrb[4].mxu1 %v534_v61 }
 0x1dc   :  { %1146 = vmatprep.mubr.msk.bf16.mxu1 %vm1560_vm0, %v1559_v0  ;;  %1131 = vmatpush3.bf16.msra.mxu1 %v1243_v12 }
 0x1dd   :  { %1132 = vmatprep.subr.bf16.mxu1 %v1559_v0 }
 0x1e0   :  { %1133 = vmatpush3.bf16.msra.mxu1 %v1244_v13 }
 0x1e1   :  { %1134 = vmatprep.subr.bf16.mxu1 %v1559_v0 }
 0x1e4   :  { %1135 = vmatpush3.bf16.msra.mxu1 %v1245_v38 }
 0x1e5   :  { %1136 = vmatprep.subr.bf16.mxu1 %v1559_v0 }
 0x1e8   :  { %1137 = vmatpush3.bf16.msra.mxu1 %v1246_v39 }
 0x1e9   :  { %1138 = vmatprep.subr.bf16.mxu1 %v1559_v0 }
 0x1ec   :  { %1139 = vmatpush3.bf16.msra.mxu1 %v1247_v40 }
 0x1ed   :  { %1140 = vmatprep.subr.bf16.mxu1 %v1559_v0 }
 0x1f0   :  { %1141 = vmatpush3.bf16.msra.mxu1 %v1248_v41 }
 0x1f1   :  { %1142 = vmatprep.subr.bf16.mxu1 %v1559_v0 }
 0x1f4   :  { %1143 = vmatpush3.bf16.msra.mxu1 %v1249_v42 }
 0x1f5   :  { %1144 = vmatprep.subr.bf16.mxu1 %v1559_v0  ;;  %v818_v0 = vstv %s1832_s0 }
 0x1f8   :  { %1145 = vmatpush3.bf16.msra.mxu1 %v1250_v43 }
 0x28e   :  { %v487_v14 = vpop.f32.mrb[0].mxu1  ;;  %v528_v15 = vpop.f32.mrb[4].mxu0 }
 0x28f   :  { %v489_v16 = vpop.f32.mrb[1].mxu1  ;;  %v1108_v17 = vpop.f32.mrb[5].mxu0 }
 0x290   :  { %v491_v18 = vpop.f32.mrb[2].mxu1  ;;  %v531_v19 = vpop.f32.mrb[6].mxu0 }
 0x291   :  { %v492_v20 = vpop.f32.mrb[3].mxu1  ;;  %v1109_v21 = vpop.f32.mrb[7].mxu0 }
 0x2ae   :  { %v665_v23 = vpop.f32.mrb[4].mxu1 }
 0x2af   :  { %v672_v25 = vadd.f32 %v665_v23, %v487_v14  ;;  %v667_v26 = vpop.f32.mrb[5].mxu1 }
 0x2b0   :  { %v673_v27 = vadd.f32 %v667_v26, %v489_v16  ;;  %v669_v28 = vpop.f32.mrb[6].mxu1 }
 0x2b1   :  { %v686_v29 = vadd.f32 %v679_v3, %v672_v25  ;;  %v670_v30 = vpop.f32.mrb[7].mxu1 }
 0x2b2   :  { %v687_v31 = vadd.f32 %v683_v24, %v673_v27 }
 0x2b3   :  { %v1015_v44 = vmul.f32 -1.442695, %v686_v29 }
 0x2b4   :  { %v1016_v32 = vmul.f32 -1.442695, %v687_v31 }
 0x2b6   :  { %1253 = vpow2.f32 %v1016_v32 }
 0x2c0   :  { %v1254_v33 = vpop.eup %1253 }
 0x2c1   :  { %v695_v34 = vadd.f32 1.0, %v1254_v33 }
 0x2c3   :  { %1255 = vrcp.f32 %v695_v34 }
 0x2c4   :  { %1257 = vpow2.f32 %v1015_v44 }
 0x2cd   :  { %v1256_v35 = vpop.eup %1255 }
 0x2ce   :  { %v700_v36 = vmul.f32 %v1256_v35, %v1781_v60  ;;  %v1258_v45 = vpop.eup %1257 }
 0x2cf   :  { %v694_v51 = vadd.f32 1.0, %v1258_v45 }
 0x2d0   :  { %v701_v37 = vpack.c.bf16 %v700_v36, %v700_v36 }
 0x2d2   :  { %1127 = vmatmul.mubr.bf16.vlgmr.msra.gmra.mrb[8].mxu0 %v701_v37 }
 0x3a5   :  { %v800_v46 = vpop.f32.mrb[8].mxu0 }
 0x3a6   :  { %v806_v48 = vadd.f32 %v800_v46, %v528_v15  ;;  %v1128_v49 = vpop.f32.mrb[9].mxu0 }
 0x3a7   :  { %v803_v50 = vpop.f32.mrb[10].mxu0 }
 0x3a8   :  { %v814_v52 = vadd.f32 %v1025_v47, %v806_v48  ;;  %v1129_v53 = vpop.f32.mrb[11].mxu0 }
 0x3aa   :  { %1259 = vtanh.f32 %v814_v52 }
 0x3ab   :  { %1261 = vrcp.f32 %v694_v51 }
 0x3b4   :  { %v1260_v54 = vpop.eup %1259 }
 0x3b5   :  { %v816_v55 = vsub.f32 %v1260_v54, %v1781_v60  ;;  %v1262_v56 = vpop.eup %1261 }
 0x3b7   :  { %v817_v57 = vmul.f32 %v1262_v56, %v816_v55 }
 0x3b9   :  { %v819_v58 = vmul.f32 %v818_v0, %v817_v57 }
 0x3bb   :  { %v820_v59 = vadd.f32 %v819_v58, %v1781_v60 }
 0x3bd   :  { %v822_v61 = vpack.c.bf16 %v820_v59, %v820_v59  ;;  %931 = vst [vmem:[#allocation22] sm:$0xff] %v820_v59 }
 0x3bf   :  { %1147 = vmatmul.mubr.bf16.vlgmr.msra.gmra.mrb[8].mxu1 %v822_v61 }
 0x3c0   :  { %1494 = shalt.err (!%p1491_p0)
}
 0x3c1   :  { %s1495_s0 = scalar_lea.hbm %s1844_s12, 128 }
 0x3c2   :  { %p1496_p1 = scmp.ne.s32.totalorder %s1844_s12, %s1495_s0  ;;  %p1499_p2 = scmp.lt.u32.totalorder %s1495_s0, %s1844_s12 }
 0x3c4   :  { %p1501_p3 = pnand %p1499_p2, %p1496_p1 }
 0x3c6   :  { %1504 = shalt.err (!%p1501_p3)
}
 0x3c7   :  { %951 = dma.vmem_to_hbm [thread:$0]  %s949_s13, 128, %s1844_s12, [#allocation23]  }
 0x3c8   :  { %s1563_s14 = smov [#allocation21]  }
 0x3c9   :  { %s938_s7 = sshll.u32 %s1563_s14, 4  ;;  %s939_s7 = int_to_ptr.vmem [resolvable:$true] %s938_s7 }
 0x3ca   :  { %s1505_s15 = scalar_lea.vmem %s939_s7, 128  ;;  %p1510_p5 = scmp.lt.s32.totalorder %s939_s7, %s939_s7 }
 0x3cb   :  { %p1506_p4 = scmp.ne.s32.totalorder %s939_s7, %s1505_s15  ;;  %p1511_p6 = scmp.lt.s32.totalorder %s1505_s15, %s1505_s15 }
 0x3cd   :  { %p1512_p7 = por %p1511_p6, %p1510_p5 }
 0x3cf   :  { %p1513_p8 = pnand %p1512_p7, %p1506_p4 }
 0x492   :  { %v921_v60 = vpop.f32.mrb[8].mxu1 }
 0x493   :  { %927 = vst [vmem:[#allocation21] sm:$0xff] %v921_v60  ;;  %v1148_v62 = vpop.f32.mrb[9].mxu1 }
 0x494   :  { %v924_v63 = vpop.f32.mrb[10].mxu1 }
 0x495   :  { %1516 = shalt.err (!%p1513_p8)
}
 0x496   :  { %s1517_s19 = scalar_lea.hbm %s1843_s11, 128 }
 0x497   :  { %p1518_p9 = scmp.ne.s32.totalorder %s1843_s11, %s1517_s19  ;;  %p1521_p10 = scmp.lt.u32.totalorder %s1517_s19, %s1843_s11 }
 0x499   :  { %p1523_p11 = pnand %p1521_p10, %p1518_p9 }
 0x49b   :  { %1526 = shalt.err (!%p1523_p11)
}
 0x49c   :  { %941 = dma.vmem_to_hbm [thread:$0]  %s939_s7, 128, %s1843_s11, [#allocation6]   ;;  %v1149_v1 = vpop.f32.mrb[11].mxu1 }
 0x49d   :  { %1539 = dma.done.wait [#allocation6], 128  }
 0x49e   :  { %1540 = vsyncadd [#allocation6], 4294967168 }
 0x49f   :  { %1541 = dma.done.wait [#allocation23], 128  }
 0x4a0   :  { %1542 = vsyncadd [#allocation23], 4294967168 }
 0x4a1   :  { %958 = vsyncpa [#allocation5], 1 }
 0x4a2   :  { %959 = vsyncpa [#allocation8], 1 }
 0x4a3   :  { %960 = vsyncpa [#allocation11], 1 }
 0x4a4   :  { %961 = vsyncpa [#allocation14], 1 }
 0x4a5   :  { %962 = vsyncpa [#allocation17], 1 }
 0x4a6   :  { %963 = vsyncpa [#allocation20], 1 }
 0x4a7   :  { %964 = vsyncpa [#allocation6], 1 }
 0x4a8   :  { %965 = vsyncpa [#allocation23], 1 }

</bundles_post_ra>
